<compile_context>
chip_gen: v5e
topology: v5e:2x2
jax: 0.10.0
libtpu: 0.0.40
codegen_flags: <defaults>
</compile_context>

<pallas_src>
import math
from functools import partial

import numpy as np
import jax
import jax.numpy as jnp
from jax import lax
from jax.experimental import pallas as pl
from jax.experimental.pallas import tpu as pltpu

# Small, self-consistent model dims (same as the validated baseline)
B = 2       # batch
M = 16      # mel bins (in_dims)
T = 16      # frames
H = 32      # conditioning channels (hidden_size)
C = 32      # residual channels
L = 2       # residual layers, dilation = 2**i
BT = B * T  # batch folded into the row (sublane) dimension

_SQRT2_INV = 1.0 / math.sqrt(2.0)
_SQRTL_INV = 1.0 / math.sqrt(L)


def _softplus(v):
    # numerically-stable softplus built from exp/log
    return jnp.maximum(v, 0.0) + jnp.log(1.0 + jnp.exp(-jnp.abs(v)))


def _mm(a, b, md):
    """Matmul with operands cast to `md` and f32 accumulation (MXU-style)."""
    return lax.dot_general(a.astype(md), b.astype(md),
                           (((a.ndim - 1,), (0,)), ((), ())),
                           preferred_element_type=jnp.float32)


# --------------------------------------------------------------------------
# Pallas kernel: whole batch in one invocation, rows = (batch, time) pairs.
# --------------------------------------------------------------------------
def denoise_kernel(x_ref, dstep_ref, mask_ref, condg_ref, condf_ref,
                   Win_ref, bin_ref, Wg_ref, Wf_ref,
                   Wres_ref, bres_ref, Wskip_ref, bskip_ref,
                   Ws_ref, bs_ref, Wout_ref, bout_ref, out_ref):
    dot = lambda a, b: jnp.dot(a, b, preferred_element_type=jnp.float32)
    bf16 = jnp.bfloat16

    x = x_ref[...]                                               # (BT, M) bf16
    # input 1x1 conv + relu (bf16 MXU feed, f32 accumulate)
    y = jnp.maximum(dot(x, Win_ref[...]) + bin_ref[...], 0.0)    # (BT, C) f32

    # loop-invariant broadcasts hoisted OUT of the unrolled layer loop
    # (dstep is a single row: t is identical for every batch element in
    #  Wrapper.forward — this breaks if per-sample t is ever introduced).
    dstep = jnp.broadcast_to(dstep_ref[...], (BT, C))            # (BT, C)
    skip = jnp.zeros((BT, C), jnp.float32)

    for i in range(L):                    # tiny static loop -> fully unrolled
        d = 2 ** i
        z = y + dstep                                            # (BT, C)
        # dilated-conv taps via XLU rolls; pre-broadcast masks zero any row
        # whose tap crosses a batch/time boundary (per-batch 'same' padding)
        zm = pltpu.roll(z, shift=d, axis=0) * mask_ref[2 * i]          # z[t-d]
        zp = pltpu.roll(z, shift=BT - d, axis=0) * mask_ref[2 * i + 1]  # z[t+d]
        op = jnp.concatenate([zm, z, zp], axis=-1).astype(bf16)  # (BT, 3C)
        # gate / filter as two lane-dense N=C matmuls (no mid-vreg slices);
        # conditioner projection + conv/cond biases precomputed (t/x-invariant)
        g = dot(op, Wg_ref[i]) + condg_ref[i]                    # (BT, C)
        f = dot(op, Wf_ref[i]) + condf_ref[i]                    # (BT, C)
        u = (jax.nn.sigmoid(g) * jnp.tanh(f)).astype(bf16)       # gated act
        # residual / skip as two lane-dense N=C matmuls
        y = (y + dot(u, Wres_ref[i]) + bres_ref[i]) * _SQRT2_INV
        skip = skip + dot(u, Wskip_ref[i]) + bskip_ref[i]

    s = (skip * _SQRTL_INV).astype(bf16)
    s = jnp.maximum(dot(s, Ws_ref[...]) + bs_ref[...], 0.0).astype(bf16)
    out_ref[...] = (dot(s, Wout_ref[...]) + bout_ref[...]).astype(out_ref.dtype)


# --------------------------------------------------------------------------
# One-time setup (== Wrapper.__init__(net, cond)): fuse + cast weights,
# precompute conditioner projections and dilation boundary masks.
# --------------------------------------------------------------------------
def prepare_state(cond, params):
    (Win, bin_, W1, b1, W2, b2, Wt, bt, Wc, bc, Wd, bd, Wo, bo,
     Ws, bs, Wout, bout) = params
    bf16 = jnp.bfloat16

    # conditioner is constant across the whole sampling loop and all layers'
    # inputs -> project it once (bf16 MXU feed to match the kernel's dots)
    cond2 = jnp.transpose(cond, (0, 2, 1)).reshape(BT, H)          # (BT, H)
    condp = jnp.stack([_mm(cond2, Wc[i], bf16) + bc[i] + bd[i]
                       for i in range(L)])                         # (L, BT, 2C)
    condg = condp[:, :, :C]      # gate (sigmoid) half, (L, BT, C)
    condf = condp[:, :, C:]      # filter (tanh)  half, (L, BT, C)

    # fused tap weights: rows = [tap t-d | tap t | tap t+d], split gate/filter
    Wtaps = jnp.concatenate([Wd[:, 0], Wd[:, 1], Wd[:, 2]], axis=1)  # (L,3C,2C)
    Wg = Wtaps[:, :, :C].astype(bf16)
    Wf = Wtaps[:, :, C:].astype(bf16)
    Wres = Wo[:, :, :C].astype(bf16)
    bres = bo[:, :, :C]
    Wskip = Wo[:, :, C:].astype(bf16)
    bskip = bo[:, :, C:]

    # per-dilation boundary masks, pre-broadcast to full channel width
    tmod = np.arange(BT) % T
    rows = []
    for i in range(L):
        d = 2 ** i
        rows.append((tmod - d >= 0).astype(np.float32))   # tap t-d in range
        rows.append((tmod + d < T).astype(np.float32))    # tap t+d in range
    masks = jnp.asarray(
        np.repeat(np.stack(rows, 0)[:, :, None], C, axis=2))       # (2L,BT,C)

    return dict(masks=masks, condg=condg, condf=condf,
                Win=Win.astype(bf16), bin=bin_,
                Wg=Wg, Wf=Wf, Wres=Wres, bres=bres, Wskip=Wskip, bskip=bskip,
                Ws=Ws.astype(bf16), bs=bs, Wout=Wout.astype(bf16), bout=bout,
                W1=W1, b1=b1, W2=W2, b2=b2, Wt=Wt, bt=bt)


# --------------------------------------------------------------------------
# Per-step forward (scalar glue + pallas_call + layout under one trace)
# --------------------------------------------------------------------------
def _forward_impl(t100, x, state):
    # SinusoidalPosEmb + step MLP + step projection, computed ONCE per step
    # (t is identical for every batch element in Wrapper.forward).
    half = C // 2
    scale = math.log(10000.0) / (half - 1)
    freqs = jnp.exp(-scale * jnp.arange(half, dtype=jnp.float32))
    ang = jnp.asarray(t100, dtype=jnp.float32) * freqs
    temb = jnp.concatenate([jnp.sin(ang), jnp.cos(ang)])[None, :]   # (1, C)
    h = temb @ state['W1'] + state['b1']
    h = h * jnp.tanh(_softplus(h))                                  # Mish
    temb = h @ state['W2'] + state['b2']                            # (1, C)
    dstep = temb @ state['Wt'] + state['bt']                        # (1, C)

    # fold batch into rows: time on sublanes, channels on lanes; bf16 MXU feed
    # TODO(synk): at production T relayout x in-kernel (pltpu.einshape) or via
    # BlockSpec instead of materializing a transposed copy every step.
    x2 = jnp.transpose(x[:, 0], (0, 2, 1)).reshape(BT, M).astype(jnp.bfloat16)

    inputs = (x2, dstep, state['masks'], state['condg'], state['condf'],
              state['Win'], state['bin'], state['Wg'], state['Wf'],
              state['Wres'], state['bres'], state['Wskip'], state['bskip'],
              state['Ws'], state['bs'], state['Wout'], state['bout'])
    vmem = pl.BlockSpec(memory_space=pltpu.MemorySpace.VMEM)
    out = pl.pallas_call(
        denoise_kernel,
        out_shape=jax.ShapeDtypeStruct((BT, M), jnp.float32),
        in_specs=[vmem] * len(inputs),
        out_specs=vmem,
        compiler_params=pltpu.CompilerParams(
            vmem_limit_bytes=32 * 1024 * 1024),
    )(*inputs)

    # back to PyTorch layout [B, 1, M, T]
    return jnp.transpose(out.reshape(B, T, M), (0, 2, 1))[:, None, :, :]


_forward_jit = jax.jit(_forward_impl)


def wrapper_forward(t, x, state):
    """Pallas equivalent of Wrapper.forward(t, x, args) for a Python float t."""
    # torch.tensor([t * 100] * B).long(): truncation toward zero for t >= 0.
    return _forward_jit(int(t * 100), x, state)


@partial(jax.jit, static_argnums=(2,))
def sample_euler_fused(x0, state, n_steps):
    """Reflow Euler sampler with the whole t-loop folded into ONE dispatch
    (perf feedback #1: amortize launch overhead across sampler steps)."""
    dt = 1.0 / n_steps

    def step(i, xc):
        t = i.astype(jnp.float32) * dt
        t100 = (t * 100.0).astype(jnp.int32)   # == torch .long() truncation
        v = _forward_impl(t100, xc, state)
        return xc + dt * v

    return lax.fori_loop(0, n_steps, step, x0)


# --------------------------------------------------------------------------
# Deterministic synthetic weights + pure-JAX reference for validation
# --------------------------------------------------------------------------
def init_params(key):
    ks = jax.random.split(key, 18)
    n = lambda k, shape, fan: jax.random.normal(k, shape, jnp.float32) / math.sqrt(fan)
    Win = n(ks[0], (M, C), M);            bin_ = n(ks[1], (1, C), C)
    W1 = n(ks[2], (C, 4 * C), C);         b1 = n(ks[3], (1, 4 * C), 4 * C)
    W2 = n(ks[4], (4 * C, C), 4 * C);     b2 = n(ks[5], (1, C), C)
    Wt = n(ks[6], (C, C), C);             bt = n(ks[7], (1, C), C)
    Wc = n(ks[8], (L, H, 2 * C), H);      bc = n(ks[9], (L, 1, 2 * C), 2 * C)
    Wd = n(ks[10], (L, 3, C, 2 * C), 3 * C); bd = n(ks[11], (L, 1, 2 * C), 2 * C)
    Wo = n(ks[12], (L, C, 2 * C), C);     bo = n(ks[13], (L, 1, 2 * C), 2 * C)
    Ws = n(ks[14], (C, C), C);            bs = n(ks[15], (1, C), C)
    Wout = n(ks[16], (C, M), C);          bout = n(ks[17], (1, M), M)
    return (Win, bin_, W1, b1, W2, b2, Wt, bt, Wc, bc, Wd, bd, Wo, bo,
            Ws, bs, Wout, bout)


def denoise_ref(t100, x, cond, params, matmul_dtype=jnp.bfloat16):
    """Pure-JAX reference mirroring the PyTorch DiffNet semantics.
    `matmul_dtype` controls the precision the channel matmuls are fed with
    (bfloat16 mirrors the kernel's MXU feed; the step-embedding MLP stays f32
    in both, since the wrapper computes it in f32)."""
    (Win, bin_, W1, b1, W2, b2, Wt, bt, Wc, bc, Wd, bd, Wo, bo,
     Ws, bs, Wout, bout) = params
    mdot = lambda a, b: _mm(a, b, matmul_dtype)

    b = x.shape[0]
    t_long = jnp.full((b,), t100, dtype=jnp.int32)
    half = C // 2
    scale = math.log(10000.0) / (half - 1)
    freqs = jnp.exp(-scale * jnp.arange(half, dtype=jnp.float32))
    ang = t_long.astype(jnp.float32)[:, None] * freqs[None, :]
    temb = jnp.concatenate([jnp.sin(ang), jnp.cos(ang)], axis=-1)   # (B, C)

    xk = jnp.transpose(x[:, 0], (0, 2, 1))      # (B, T, M)
    ck = jnp.transpose(cond, (0, 2, 1))         # (B, T, H)

    h = temb @ W1 + b1
    h = h * jnp.tanh(_softplus(h))
    temb = h @ W2 + b2                          # (B, C)
    dstep = temb @ Wt + bt                      # (B, C)

    y = jnp.maximum(mdot(xk, Win) + bin_, 0.0)  # (B, T, C)
    skip_sum = jnp.zeros_like(y)
    for i in range(L):
        d = 2 ** i
        condp = mdot(ck, Wc[i]) + bc[i]
        z = y + dstep[:, None, :]
        zpad = jnp.pad(z, ((0, 0), (d, d), (0, 0)))
        conv = bd[i]
        for k in range(3):
            conv = conv + mdot(zpad[:, k * d:k * d + T, :], Wd[i, k])
        v = conv + condp
        u = jax.nn.sigmoid(v[..., :C]) * jnp.tanh(v[..., C:])
        w = mdot(u, Wo[i]) + bo[i]
        y = (y + w[..., :C]) * _SQRT2_INV
        skip_sum = skip_sum + w[..., C:]
    s = skip_sum * _SQRTL_INV
    s = jnp.maximum(mdot(s, Ws) + bs, 0.0)
    out = mdot(s, Wout) + bout                  # (B, T, M)
    return jnp.transpose(out, (0, 2, 1))[:, None, :, :]


if __name__ == "__main__":
    key = jax.random.PRNGKey(0)
    kx, kc, kp = jax.random.split(key, 3)
    x = jax.random.normal(kx, (B, 1, M, T), jnp.float32)     # noisy mel (NCHW)
    cond = jax.random.normal(kc, (B, H, T), jnp.float32)     # self.cond
    params = init_params(kp)
    state = prepare_state(cond, params)                      # == Wrapper(net, cond)
    t = 0.37                                                 # flow time scalar

    out = wrapper_forward(t, x, state)
    out = jax.block_until_ready(out)
    assert out.shape == (B, 1, M, T)

    # tight check vs a reference fed with the same bf16 matmul operands
    ref16 = denoise_ref(int(t * 100), x, cond, params, matmul_dtype=jnp.bfloat16)
    np.testing.assert_allclose(np.asarray(out), np.asarray(ref16),
                               rtol=2e-3, atol=2e-3)

    # sanity check vs the full-f32 module semantics (bf16 MXU feed ~1e-2 abs)
    ref32 = denoise_ref(int(t * 100), x, cond, params, matmul_dtype=jnp.float32)
    np.testing.assert_allclose(np.asarray(out), np.asarray(ref32),
                               rtol=1e-1, atol=1e-1)

    # fused sampler: whole reflow t-loop in one dispatch (perf feedback #1)
    xs = jax.block_until_ready(sample_euler_fused(x, state, 4))
    assert xs.shape == x.shape
    assert bool(jnp.all(jnp.isfinite(xs)))

    print("KERNEL_OK")
</pallas_src>

<mosaic_0001>
module attributes {stable_mosaic.version = 11 : i64} {
  func.func @denoise_kernel(%arg0: memref<32x16xbf16, #tpu.memory_space<vmem>>, %arg1: memref<1x32xf32, #tpu.memory_space<vmem>>, %arg2: memref<4x32x32xf32, #tpu.memory_space<vmem>>, %arg3: memref<2x32x32xf32, #tpu.memory_space<vmem>>, %arg4: memref<2x32x32xf32, #tpu.memory_space<vmem>>, %arg5: memref<16x32xbf16, #tpu.memory_space<vmem>>, %arg6: memref<1x32xf32, #tpu.memory_space<vmem>>, %arg7: memref<2x96x32xbf16, #tpu.memory_space<vmem>>, %arg8: memref<2x96x32xbf16, #tpu.memory_space<vmem>>, %arg9: memref<2x32x32xbf16, #tpu.memory_space<vmem>>, %arg10: memref<2x1x32xf32, #tpu.memory_space<vmem>>, %arg11: memref<2x32x32xbf16, #tpu.memory_space<vmem>>, %arg12: memref<2x1x32xf32, #tpu.memory_space<vmem>>, %arg13: memref<32x32xbf16, #tpu.memory_space<vmem>>, %arg14: memref<1x32xf32, #tpu.memory_space<vmem>>, %arg15: memref<32x16xbf16, #tpu.memory_space<vmem>>, %arg16: memref<1x16xf32, #tpu.memory_space<vmem>>, %arg17: memref<32x16xf32, #tpu.memory_space<vmem>>) attributes {dimension_semantics = [], scalar_prefetch = 0 : i64, scratch_operands = 0 : i64, tpu.core_type = #tpu.core_type<tc>} {
    %c0 = arith.constant 0 : index
    %c0_0 = arith.constant 0 : index
    %0 = vector.load %arg0[%c0, %c0_0] : memref<32x16xbf16, #tpu.memory_space<vmem>>, vector<32x16xbf16>
    %c0_1 = arith.constant 0 : index
    %c0_2 = arith.constant 0 : index
    %1 = vector.load %arg5[%c0_1, %c0_2] : memref<16x32xbf16, #tpu.memory_space<vmem>>, vector<16x32xbf16>
    %cst = arith.constant dense<0.000000e+00> : vector<32x32xf32>
    %2 = tpu.matmul %0, %1, %cst {dimension_numbers = #tpu.dot_dimension_numbers<[1], [0], [0], [1], [0, 0, 1, 1], [], []>} : vector<32x16xbf16>, vector<16x32xbf16>, vector<32x32xf32> -> vector<32x32xf32>
    %c0_3 = arith.constant 0 : index
    %c0_4 = arith.constant 0 : index
    %3 = vector.load %arg6[%c0_3, %c0_4] : memref<1x32xf32, #tpu.memory_space<vmem>>, vector<1x32xf32>
    %4 = vector.broadcast %3 : vector<1x32xf32> to vector<32x32xf32>
    %5 = arith.addf %2, %4 : vector<32x32xf32>
    %cst_5 = arith.constant 0.000000e+00 : f32
    %6 = vector.broadcast %cst_5 : f32 to vector<32x32xf32>
    %7 = arith.maximumf %5, %6 : vector<32x32xf32>
    %c0_6 = arith.constant 0 : index
    %c0_7 = arith.constant 0 : index
    %8 = vector.load %arg1[%c0_6, %c0_7] : memref<1x32xf32, #tpu.memory_space<vmem>>, vector<1x32xf32>
    %9 = vector.shape_cast %8 : vector<1x32xf32> to vector<1x32xf32>
    %10 = vector.broadcast %9 : vector<1x32xf32> to vector<32x32xf32>
    %cst_8 = arith.constant 0.000000e+00 : f32
    %11 = vector.broadcast %cst_8 : f32 to vector<32x32xf32>
    %12 = arith.addf %7, %10 : vector<32x32xf32>
    %c1_i32 = arith.constant 1 : i32
    %13 = tpu.dynamic_rotate %12 by %c1_i32 dim 0 : vector<32x32xf32>, i32 -> vector<32x32xf32>
    %c0_9 = arith.constant 0 : index
    %c0_10 = arith.constant 0 : index
    %c0_11 = arith.constant 0 : index
    %14 = vector.load %arg2[%c0_9, %c0_10, %c0_11] : memref<4x32x32xf32, #tpu.memory_space<vmem>>, vector<1x32x32xf32>
    %15 = vector.shape_cast %14 : vector<1x32x32xf32> to vector<32x32xf32>
    %16 = arith.mulf %13, %15 : vector<32x32xf32>
    %c31_i32 = arith.constant 31 : i32
    %17 = tpu.dynamic_rotate %12 by %c31_i32 dim 0 : vector<32x32xf32>, i32 -> vector<32x32xf32>
    %c1 = arith.constant 1 : index
    %c0_12 = arith.constant 0 : index
    %c0_13 = arith.constant 0 : index
    %18 = vector.load %arg2[%c1, %c0_12, %c0_13] : memref<4x32x32xf32, #tpu.memory_space<vmem>>, vector<1x32x32xf32>
    %19 = vector.shape_cast %18 : vector<1x32x32xf32> to vector<32x32xf32>
    %20 = arith.mulf %17, %19 : vector<32x32xf32>
    %21 = tpu.concatenate %16, %12, %20 in 1 : vector<32x32xf32>, vector<32x32xf32>, vector<32x32xf32> -> vector<32x96xf32>
    %22 = arith.truncf %21 : vector<32x96xf32> to vector<32x96xbf16>
    %c0_14 = arith.constant 0 : index
    %c0_15 = arith.constant 0 : index
    %c0_16 = arith.constant 0 : index
    %23 = vector.load %arg7[%c0_14, %c0_15, %c0_16] : memref<2x96x32xbf16, #tpu.memory_space<vmem>>, vector<1x96x32xbf16>
    %24 = vector.shape_cast %23 : vector<1x96x32xbf16> to vector<96x32xbf16>
    %cst_17 = arith.constant dense<0.000000e+00> : vector<32x32xf32>
    %25 = tpu.matmul %22, %24, %cst_17 {dimension_numbers = #tpu.dot_dimension_numbers<[1], [0], [0], [1], [0, 0, 1, 1], [], []>} : vector<32x96xbf16>, vector<96x32xbf16>, vector<32x32xf32> -> vector<32x32xf32>
    %c0_18 = arith.constant 0 : index
    %c0_19 = arith.constant 0 : index
    %c0_20 = arith.constant 0 : index
    %26 = vector.load %arg3[%c0_18, %c0_19, %c0_20] : memref<2x32x32xf32, #tpu.memory_space<vmem>>, vector<1x32x32xf32>
    %27 = vector.shape_cast %26 : vector<1x32x32xf32> to vector<32x32xf32>
    %28 = arith.addf %25, %27 : vector<32x32xf32>
    %c0_21 = arith.constant 0 : index
    %c0_22 = arith.constant 0 : index
    %c0_23 = arith.constant 0 : index
    %29 = vector.load %arg8[%c0_21, %c0_22, %c0_23] : memref<2x96x32xbf16, #tpu.memory_space<vmem>>, vector<1x96x32xbf16>
    %30 = vector.shape_cast %29 : vector<1x96x32xbf16> to vector<96x32xbf16>
    %cst_24 = arith.constant dense<0.000000e+00> : vector<32x32xf32>
    %31 = tpu.matmul %22, %30, %cst_24 {dimension_numbers = #tpu.dot_dimension_numbers<[1], [0], [0], [1], [0, 0, 1, 1], [], []>} : vector<32x96xbf16>, vector<96x32xbf16>, vector<32x32xf32> -> vector<32x32xf32>
    %c0_25 = arith.constant 0 : index
    %c0_26 = arith.constant 0 : index
    %c0_27 = arith.constant 0 : index
    %32 = vector.load %arg4[%c0_25, %c0_26, %c0_27] : memref<2x32x32xf32, #tpu.memory_space<vmem>>, vector<1x32x32xf32>
    %33 = vector.shape_cast %32 : vector<1x32x32xf32> to vector<32x32xf32>
    %34 = arith.addf %31, %33 : vector<32x32xf32>
    %35 = arith.negf %28 : vector<32x32xf32>
    %36 = math.exp %35 : vector<32x32xf32>
    %cst_28 = arith.constant 1.000000e+00 : f32
    %37 = vector.broadcast %cst_28 : f32 to vector<32x32xf32>
    %38 = arith.addf %37, %36 : vector<32x32xf32>
    %39 = arith.divf %37, %38 : vector<32x32xf32>
    %40 = math.tanh %34 : vector<32x32xf32>
    %41 = arith.mulf %39, %40 : vector<32x32xf32>
    %42 = arith.truncf %41 : vector<32x32xf32> to vector<32x32xbf16>
    %c0_29 = arith.constant 0 : index
    %c0_30 = arith.constant 0 : index
    %c0_31 = arith.constant 0 : index
    %43 = vector.load %arg9[%c0_29, %c0_30, %c0_31] : memref<2x32x32xbf16, #tpu.memory_space<vmem>>, vector<1x32x32xbf16>
    %44 = vector.shape_cast %43 : vector<1x32x32xbf16> to vector<32x32xbf16>
    %cst_32 = arith.constant dense<0.000000e+00> : vector<32x32xf32>
    %45 = tpu.matmul %42, %44, %cst_32 {dimension_numbers = #tpu.dot_dimension_numbers<[1], [0], [0], [1], [0, 0, 1, 1], [], []>} : vector<32x32xbf16>, vector<32x32xbf16>, vector<32x32xf32> -> vector<32x32xf32>
    %46 = arith.addf %7, %45 : vector<32x32xf32>
    %c0_33 = arith.constant 0 : index
    %c0_34 = arith.constant 0 : index
    %c0_35 = arith.constant 0 : index
    %47 = vector.load %arg10[%c0_33, %c0_34, %c0_35] : memref<2x1x32xf32, #tpu.memory_space<vmem>>, vector<1x1x32xf32>
    %48 = vector.shape_cast %47 : vector<1x1x32xf32> to vector<1x32xf32>
    %49 = vector.broadcast %48 : vector<1x32xf32> to vector<32x32xf32>
    %50 = arith.addf %46, %49 : vector<32x32xf32>
    %cst_36 = arith.constant 0.707106769 : f32
    %51 = vector.broadcast %cst_36 : f32 to vector<32x32xf32>
    %52 = arith.mulf %50, %51 : vector<32x32xf32>
    %c0_37 = arith.constant 0 : index
    %c0_38 = arith.constant 0 : index
    %c0_39 = arith.constant 0 : index
    %53 = vector.load %arg11[%c0_37, %c0_38, %c0_39] : memref<2x32x32xbf16, #tpu.memory_space<vmem>>, vector<1x32x32xbf16>
    %54 = vector.shape_cast %53 : vector<1x32x32xbf16> to vector<32x32xbf16>
    %cst_40 = arith.constant dense<0.000000e+00> : vector<32x32xf32>
    %55 = tpu.matmul %42, %54, %cst_40 {dimension_numbers = #tpu.dot_dimension_numbers<[1], [0], [0], [1], [0, 0, 1, 1], [], []>} : vector<32x32xbf16>, vector<32x32xbf16>, vector<32x32xf32> -> vector<32x32xf32>
    %56 = arith.addf %11, %55 : vector<32x32xf32>
    %c0_41 = arith.constant 0 : index
    %c0_42 = arith.constant 0 : index
    %c0_43 = arith.constant 0 : index
    %57 = vector.load %arg12[%c0_41, %c0_42, %c0_43] : memref<2x1x32xf32, #tpu.memory_space<vmem>>, vector<1x1x32xf32>
    %58 = vector.shape_cast %57 : vector<1x1x32xf32> to vector<1x32xf32>
    %59 = vector.broadcast %58 : vector<1x32xf32> to vector<32x32xf32>
    %60 = arith.addf %56, %59 : vector<32x32xf32>
    %61 = arith.addf %52, %10 : vector<32x32xf32>
    %c2_i32 = arith.constant 2 : i32
    %62 = tpu.dynamic_rotate %61 by %c2_i32 dim 0 : vector<32x32xf32>, i32 -> vector<32x32xf32>
    %c2 = arith.constant 2 : index
    %c0_44 = arith.constant 0 : index
    %c0_45 = arith.constant 0 : index
    %63 = vector.load %arg2[%c2, %c0_44, %c0_45] : memref<4x32x32xf32, #tpu.memory_space<vmem>>, vector<1x32x32xf32>
    %64 = vector.shape_cast %63 : vector<1x32x32xf32> to vector<32x32xf32>
    %65 = arith.mulf %62, %64 : vector<32x32xf32>
    %c30_i32 = arith.constant 30 : i32
    %66 = tpu.dynamic_rotate %61 by %c30_i32 dim 0 : vector<32x32xf32>, i32 -> vector<32x32xf32>
    %c3 = arith.constant 3 : index
    %c0_46 = arith.constant 0 : index
    %c0_47 = arith.constant 0 : index
    %67 = vector.load %arg2[%c3, %c0_46, %c0_47] : memref<4x32x32xf32, #tpu.memory_space<vmem>>, vector<1x32x32xf32>
    %68 = vector.shape_cast %67 : vector<1x32x32xf32> to vector<32x32xf32>
    %69 = arith.mulf %66, %68 : vector<32x32xf32>
    %70 = tpu.concatenate %65, %61, %69 in 1 : vector<32x32xf32>, vector<32x32xf32>, vector<32x32xf32> -> vector<32x96xf32>
    %71 = arith.truncf %70 : vector<32x96xf32> to vector<32x96xbf16>
    %c1_48 = arith.constant 1 : index
    %c0_49 = arith.constant 0 : index
    %c0_50 = arith.constant 0 : index
    %72 = vector.load %arg7[%c1_48, %c0_49, %c0_50] : memref<2x96x32xbf16, #tpu.memory_space<vmem>>, vector<1x96x32xbf16>
    %73 = vector.shape_cast %72 : vector<1x96x32xbf16> to vector<96x32xbf16>
    %cst_51 = arith.constant dense<0.000000e+00> : vector<32x32xf32>
    %74 = tpu.matmul %71, %73, %cst_51 {dimension_numbers = #tpu.dot_dimension_numbers<[1], [0], [0], [1], [0, 0, 1, 1], [], []>} : vector<32x96xbf16>, vector<96x32xbf16>, vector<32x32xf32> -> vector<32x32xf32>
    %c1_52 = arith.constant 1 : index
    %c0_53 = arith.constant 0 : index
    %c0_54 = arith.constant 0 : index
    %75 = vector.load %arg3[%c1_52, %c0_53, %c0_54] : memref<2x32x32xf32, #tpu.memory_space<vmem>>, vector<1x32x32xf32>
    %76 = vector.shape_cast %75 : vector<1x32x32xf32> to vector<32x32xf32>
    %77 = arith.addf %74, %76 : vector<32x32xf32>
    %c1_55 = arith.constant 1 : index
    %c0_56 = arith.constant 0 : index
    %c0_57 = arith.constant 0 : index
    %78 = vector.load %arg8[%c1_55, %c0_56, %c0_57] : memref<2x96x32xbf16, #tpu.memory_space<vmem>>, vector<1x96x32xbf16>
    %79 = vector.shape_cast %78 : vector<1x96x32xbf16> to vector<96x32xbf16>
    %cst_58 = arith.constant dense<0.000000e+00> : vector<32x32xf32>
    %80 = tpu.matmul %71, %79, %cst_58 {dimension_numbers = #tpu.dot_dimension_numbers<[1], [0], [0], [1], [0, 0, 1, 1], [], []>} : vector<32x96xbf16>, vector<96x32xbf16>, vector<32x32xf32> -> vector<32x32xf32>
    %c1_59 = arith.constant 1 : index
    %c0_60 = arith.constant 0 : index
    %c0_61 = arith.constant 0 : index
    %81 = vector.load %arg4[%c1_59, %c0_60, %c0_61] : memref<2x32x32xf32, #tpu.memory_space<vmem>>, vector<1x32x32xf32>
    %82 = vector.shape_cast %81 : vector<1x32x32xf32> to vector<32x32xf32>
    %83 = arith.addf %80, %82 : vector<32x32xf32>
    %84 = arith.negf %77 : vector<32x32xf32>
    %85 = math.exp %84 : vector<32x32xf32>
    %cst_62 = arith.constant 1.000000e+00 : f32
    %86 = vector.broadcast %cst_62 : f32 to vector<32x32xf32>
    %87 = arith.addf %86, %85 : vector<32x32xf32>
    %88 = arith.divf %86, %87 : vector<32x32xf32>
    %89 = math.tanh %83 : vector<32x32xf32>
    %90 = arith.mulf %88, %89 : vector<32x32xf32>
    %91 = arith.truncf %90 : vector<32x32xf32> to vector<32x32xbf16>
    %c1_63 = arith.constant 1 : index
    %c0_64 = arith.constant 0 : index
    %c0_65 = arith.constant 0 : index
    %92 = vector.load %arg11[%c1_63, %c0_64, %c0_65] : memref<2x32x32xbf16, #tpu.memory_space<vmem>>, vector<1x32x32xbf16>
    %93 = vector.shape_cast %92 : vector<1x32x32xbf16> to vector<32x32xbf16>
    %cst_66 = arith.constant dense<0.000000e+00> : vector<32x32xf32>
    %94 = tpu.matmul %91, %93, %cst_66 {dimension_numbers = #tpu.dot_dimension_numbers<[1], [0], [0], [1], [0, 0, 1, 1], [], []>} : vector<32x32xbf16>, vector<32x32xbf16>, vector<32x32xf32> -> vector<32x32xf32>
    %95 = arith.addf %60, %94 : vector<32x32xf32>
    %c1_67 = arith.constant 1 : index
    %c0_68 = arith.constant 0 : index
    %c0_69 = arith.constant 0 : index
    %96 = vector.load %arg12[%c1_67, %c0_68, %c0_69] : memref<2x1x32xf32, #tpu.memory_space<vmem>>, vector<1x1x32xf32>
    %97 = vector.shape_cast %96 : vector<1x1x32xf32> to vector<1x32xf32>
    %98 = vector.broadcast %97 : vector<1x32xf32> to vector<32x32xf32>
    %99 = arith.addf %95, %98 : vector<32x32xf32>
    %cst_70 = arith.constant 0.707106769 : f32
    %100 = vector.broadcast %cst_70 : f32 to vector<32x32xf32>
    %101 = arith.mulf %99, %100 : vector<32x32xf32>
    %102 = arith.truncf %101 : vector<32x32xf32> to vector<32x32xbf16>
    %c0_71 = arith.constant 0 : index
    %c0_72 = arith.constant 0 : index
    %103 = vector.load %arg13[%c0_71, %c0_72] : memref<32x32xbf16, #tpu.memory_space<vmem>>, vector<32x32xbf16>
    %cst_73 = arith.constant dense<0.000000e+00> : vector<32x32xf32>
    %104 = tpu.matmul %102, %103, %cst_73 {dimension_numbers = #tpu.dot_dimension_numbers<[1], [0], [0], [1], [0, 0, 1, 1], [], []>} : vector<32x32xbf16>, vector<32x32xbf16>, vector<32x32xf32> -> vector<32x32xf32>
    %c0_74 = arith.constant 0 : index
    %c0_75 = arith.constant 0 : index
    %105 = vector.load %arg14[%c0_74, %c0_75] : memref<1x32xf32, #tpu.memory_space<vmem>>, vector<1x32xf32>
    %106 = vector.broadcast %105 : vector<1x32xf32> to vector<32x32xf32>
    %107 = arith.addf %104, %106 : vector<32x32xf32>
    %cst_76 = arith.constant 0.000000e+00 : f32
    %108 = vector.broadcast %cst_76 : f32 to vector<32x32xf32>
    %109 = arith.maximumf %107, %108 : vector<32x32xf32>
    %110 = arith.truncf %109 : vector<32x32xf32> to vector<32x32xbf16>
    %c0_77 = arith.constant 0 : index
    %c0_78 = arith.constant 0 : index
    %111 = vector.load %arg15[%c0_77, %c0_78] : memref<32x16xbf16, #tpu.memory_space<vmem>>, vector<32x16xbf16>
    %cst_79 = arith.constant dense<0.000000e+00> : vector<32x16xf32>
    %112 = tpu.matmul %110, %111, %cst_79 {dimension_numbers = #tpu.dot_dimension_numbers<[1], [0], [0], [1], [0, 0, 1, 1], [], []>} : vector<32x32xbf16>, vector<32x16xbf16>, vector<32x16xf32> -> vector<32x16xf32>
    %c0_80 = arith.constant 0 : index
    %c0_81 = arith.constant 0 : index
    %113 = vector.load %arg16[%c0_80, %c0_81] : memref<1x16xf32, #tpu.memory_space<vmem>>, vector<1x16xf32>
    %114 = vector.broadcast %113 : vector<1x16xf32> to vector<32x16xf32>
    %115 = arith.addf %112, %114 : vector<32x16xf32>
    %c0_82 = arith.constant 0 : index
    %c0_83 = arith.constant 0 : index
    %116 = vector.load %arg17[%c0_82, %c0_83] : memref<32x16xf32, #tpu.memory_space<vmem>>, vector<32x16xf32>
    tpu.vector_store %arg17[%c0_82, %c0_83], %115 {strides = array<i32>} : memref<32x16xf32, #tpu.memory_space<vmem>>, vector<32x16xf32>,
    return
  }
}

</mosaic_0001>

<bundles_post_ra>
// kernel: _forward_impl.1
= control target key start
LH: loop header
LB: loop body
LE: loop exit
PB: predicated region body
PF: predicated region fallthrough
CT: control target
= control target key end

     0   :  { %s1876_s0 = inlined_call_operand.vmem [shape: bf16[32,16], index: 0, kind: input, shape index: {}]   ;;  %s1877_s1 = inlined_call_operand.vmem [shape: f32[1,32], index: 1, kind: input, shape index: {}]   ;;  %s1878_s2 = inlined_call_operand.vmem [shape: f32[4,32,32], index: 2, kind: input, shape index: {}]   ;;  %s1879_s3 = inlined_call_operand.vmem [shape: f32[2,32,32], index: 3, kind: input, shape index: {}]   ;;  %s1880_s4 = inlined_call_operand.vmem [shape: f32[2,32,32], index: 4, kind: input, shape index: {}]   ;;  %s1881_s5 = inlined_call_operand.vmem [shape: bf16[16,32], index: 5, kind: input, shape index: {}]   ;;  %s1882_s6 = inlined_call_operand.vmem [shape: f32[1,32], index: 6, kind: input, shape index: {}]   ;;  %s1883_s7 = inlined_call_operand.vmem [shape: bf16[2,96,32], index: 7, kind: input, shape index: {}]   ;;  %s1884_s8 = inlined_call_operand.vmem [shape: bf16[2,96,32], index: 8, kind: input, shape index: {}]   ;;  %s1885_s9 = inlined_call_operand.vmem [shape: bf16[2,32,32], index: 9, kind: input, shape index: {}]   ;;  %s1886_s10 = inlined_call_operand.vmem [shape: f32[2,1,32], index: 10, kind: input, shape index: {}]   ;;  %s1887_s11 = inlined_call_operand.hbm [shape: bf16[2,32,32], index: 11, kind: input, shape index: {}]   ;;  %s1888_s12 = inlined_call_operand.vmem [shape: f32[2,1,32], index: 12, kind: input, shape index: {}]   ;;  %s1889_s13 = inlined_call_operand.vmem [shape: bf16[32,32], index: 13, kind: input, shape index: {}]   ;;  %s1890_s14 = inlined_call_operand.vmem [shape: f32[1,32], index: 14, kind: input, shape index: {}]   ;;  %s1891_s15 = inlined_call_operand.vmem [shape: bf16[32,16], index: 15, kind: input, shape index: {}]   ;;  %s1892_s16 = inlined_call_operand.vmem [shape: f32[1,16], index: 16, kind: input, shape index: {}]   ;;  %s1893_s17 = inlined_call_operand.vmem [shape: f32[32,16], index: 17, kind: output, shape index: {}]  }
   0x1   :  { %1895 = sst [smem:[#allocation5_spill]] %s1876_s0 }
   0x2   :  { %1896 = sst [smem:[#allocation6_spill]] %s1877_s1 }
   0x3   :  { %22 = vsyncpa [#allocation3], 0  ;;  %s49_s26 = sshll.u32 %s1887_s11, 4  ;;  %s1418_s27 = smov [#allocation2]   ;;  %s50_s26 = int_to_ptr.hbm [resolvable:$true] %s49_s26 }
   0x4   :  { %s51_s28 = sshll.u32 %s1418_s27, 4  ;;  %s1419_s29 = smov 64   ;;  %s52_s28 = int_to_ptr.vmem [resolvable:$true] %s51_s28 }
   0x5   :  { %s1420_s0 = smov 4  }
   0x6   :  { %57 = dma.hbm_to_vmem [thread:$0]  %s50_s26, 512, %s52_s28, [#allocation3], %s1419_s29, %s1419_s29, %s1420_s0  }
   0x7   :  { %1416 = dma.done.wait [#allocation3], 512  }
   0x8   :  { %1417 = vsyncadd [#allocation3], 4294966784  ;;  %v1258_v0 = vld [vmem:[%s1881_s5] sm:$0xff]  ;;  %s1897_s20 = sld [smem:[#allocation5_spill]]  ;;  %vm99_vm0 = vcmask 130048   ;;  %v141_v6 = vlaneseq  ;;  %v1264_v11 = vld [vmem:[%s1883_s7 + $0x28] sm:$0xff] }
   0x9   :  { %113 = vmatpush.bf16.msra.mxu0 %v1258_v0  ;;  %v1337_v3 = vld [vmem:[%s1882_s6] ss:$0 sm:$0xff]  ;;  %s1898_s25 = sld [smem:[#allocation6_spill]]  ;;  %v1270_v12 = vld [vmem:[%s1884_s8 + $0x28] sm:$0xff]  ;;  %279 = vmatpush.bf16.msra.mxu1 %v1264_v11  ;;  %s1421_s1 = smov 32   ;;  %v1051_v46 = vld [vmem:[%s1878_s2 + $0x30] sm:$0xff] }
   0xa   :  { %v1547_v13 = vshrl.u32 %v141_v6, 7  ;;  %350 = vmatpush.bf16.msra.mxu2 %v1270_v12  ;;  %v1263_v16 = vld [vmem:[%s1883_s7 + $0x20] sm:$0xff]  ;;  %v1050_v33 = vld [vmem:[%s1878_s2 + $0x28] sm:$0xff]  ;;  %v1052_v47 = vld [vmem:[%s1878_s2 + $0x38] sm:$0xff]  ;;  %vm206_vm3 = vcmask 261120   ;;  %vm211_vm4 = vcmask 523264  }
   0xb   :  { %v1269_v17 = vld [vmem:[%s1884_s8 + $0x20] sm:$0xff]  ;;  %v1262_v55 = vld [vmem:[%s1883_s7 + $0x18] sm:$0xff]  ;;  %v1261_v57 = vld [vmem:[%s1883_s7 + $0x10] sm:$0xff]  ;;  %vm270_vm5 = vcmask 785408  }
   0xc   :  { %vm143_vm1 = vcmp.lt.s32.totalorder %v1547_v13, 1  ;;  %vm160_vm2 = vcmp.lt.s32.totalorder %v1547_v13, 7  ;;  %v1049_v32 = vld [vmem:[%s1878_s2 + $0x20] sm:$0xff]  ;;  %v1268_v56 = vld [vmem:[%s1884_s8 + $0x18] sm:$0xff]  ;;  %v1267_v58 = vld [vmem:[%s1884_s8 + $0x10] sm:$0xff] }
   0xd   :  { %280 = vmatpush.bf16.msra.mxu1 %v1263_v16  ;;  %v1260_v59 = vld [vmem:[%s1883_s7 + $0x8] sm:$0xff]  ;;  %v1259_v61 = vld [vmem:[%s1883_s7] sm:$0xff] }
   0xe   :  { %v1256_v1 = vld [vmem:[%s1897_s20] sm:$0xff]  ;;  %v1257_v2 = vld [vmem:[%s1897_s20 + $0x8] sm:$0xff]  ;;  %351 = vmatpush.bf16.msra.mxu2 %v1269_v17 }
   0xf   :  { %1047 = vmatmul.msk.bf16.vlgmr.msra.gmra.mxu0 %vm99_vm0, %v1256_v1  ;;  %v1537_v8 = vld [vmem:[%s1898_s25] ss:$0 sm:$0xff]  ;;  %v1266_v60 = vld [vmem:[%s1884_s8 + $0x8] sm:$0xff] }
  0x10   :  { %v1265_v62 = vld [vmem:[%s1884_s8] sm:$0xff]  ;;  %v149_v1 = vld [vmem:[%s1878_s2 + $0x8] sm:$0xff] }
  0x11   :  { %281 = vmatpush.bf16.msra.mxu1 %v1262_v55  ;;  %v148_v0 = vld [vmem:[%s1878_s2] sm:$0xff] }
  0x12   :  { %352 = vmatpush.bf16.msra.mxu2 %v1268_v56 }
  0x15   :  { %282 = vmatpush.bf16.msra.mxu1 %v1261_v57 }
  0x16   :  { %353 = vmatpush.bf16.msra.mxu2 %v1267_v58 }
  0x19   :  { %283 = vmatpush.bf16.msra.mxu1 %v1260_v59 }
  0x1a   :  { %354 = vmatpush.bf16.msra.mxu2 %v1266_v60 }
  0x1d   :  { %284 = vmatpush.bf16.msra.mxu1 %v1259_v61 }
  0x1e   :  { %355 = vmatpush.bf16.msra.mxu2 %v1265_v62 }
  0x1f   :  { %1048 = vmatmul.msk.bf16.gmra.mxu0 %vm99_vm0, %v1257_v2 }
  0x8c   :  { %v115_v4 = vpop.f32.mrf.mxu0 }
  0x8d   :  { %v1531_v5 = vadd.f32 %v1337_v3, %v115_v4 }
  0x8f   :  { %v125_v7 = vmax.f32 %v1531_v5, 0.0  ;;  %v1279_v5 = vld [vmem:[%s1883_s7 + $0x50] sm:$0xff] }
  0x91   :  { %v133_v14 = vadd.f32 %v1537_v8, %v125_v7 }
  0x93   :  { %v137_v19 = vrot.slane %v133_v14, 7  ;;  %v156_v27 = vrot.slane %v133_v14, 1 }
  0x94   :  { %v117_v9 = vpop.f32.mrf.mxu0 }
  0x95   :  { %v1539_v10 = vadd.f32 %v1337_v3, %v117_v9 }
  0x97   :  { %v126_v15 = vmax.f32 %v1539_v10, 0.0 }
  0x99   :  { %v134_v18 = vadd.f32 %v1537_v8, %v126_v15 }
  0x9b   :  { %v138_v20 = vrot.slane %v134_v18, 7  ;;  %v1297_v21 = vpack.i.bf16 %v134_v18, %v133_v14  ;;  %v157_v25 = vrot.slane %v134_v18, 1 }
  0x9c   :  { %v120_v22 = vpop.f32.mrf.mxu0 }
  0x9d   :  { %v1563_v23 = vadd.f32 %v1337_v3, %v120_v22  ;;  %1298 = vrot.lane.b32.xlu0 %v1297_v21, %s1421_s1  ;;  %v146_v24 = vsel %vm143_vm1, %v137_v19, %v138_v20  ;;  %v163_v31 = vsel %vm160_vm2, %v156_v27, %v157_v25  ;;  %v150_v21 = vld [vmem:[%s1878_s2 + $0x10] sm:$0xff]  ;;  %v151_v22 = vld [vmem:[%s1878_s2 + $0x18] sm:$0xff] }
  0x9e   :  { %v170_v38 = vmul.f32 %v1049_v32, %v163_v31  ;;  %v153_v6 = vmul.f32 %v149_v1, %v146_v24  ;;  %v308_v1 = vld [vmem:[%s1880_s4] sm:$0xff] }
  0x9f   :  { %v127_v26 = vmax.f32 %v1563_v23, 0.0 }
  0xa1   :  { %v135_v28 = vadd.f32 %v1537_v8, %v127_v26 }
  0xa3   :  { %v139_v29 = vrot.slane %v135_v28, 7  ;;  %v158_v30 = vrot.slane %v135_v28, 1 }
  0xa4   :  { %v122_v34 = vpop.f32.mrf.mxu0 }
  0xa5   :  { %v1581_v35 = vadd.f32 %v1337_v3, %v122_v34  ;;  %v162_v36 = vsel %vm160_vm2, %v157_v25, %v158_v30  ;;  %v145_v37 = vsel %vm143_vm1, %v138_v20, %v139_v29 }
  0xa6   :  { %v171_v39 = vmul.f32 %v1050_v33, %v162_v36 }
  0xa7   :  { %v128_v40 = vmax.f32 %v1581_v35, 0.0 }
  0xa8   :  { %v1302_v41 = vpack.i.bf16 %v171_v39, %v170_v38 }
  0xa9   :  { %v136_v42 = vadd.f32 %v1537_v8, %v128_v40 }
  0xaa   :  { %1303 = vrot.lane.b32.xlu0 %v1302_v41, %s1419_s29 }
  0xab   :  { %v140_v43 = vrot.slane %v136_v42, 7  ;;  %v159_v44 = vrot.slane %v136_v42, 1  ;;  %v1307_v45 = vpack.i.bf16 %v136_v42, %v135_v28  ;;  %v1272_v42 = vld [vmem:[%s1885_s9 + $0x8] sm:$0xff] }
  0xac   :  { %481 = vmatpush.bf16.msra.mxu3 %v1272_v42 }
  0xad   :  { %1308 = vrot.lane.b32.xlu1 %v1307_v45, %s1421_s1  ;;  %v161_v48 = vsel %vm160_vm2, %v158_v30, %v159_v44  ;;  %v164_v49 = vsel %vm160_vm2, %v159_v44, %v156_v27  ;;  %v147_v50 = vsel %vm143_vm1, %v140_v43, %v137_v19  ;;  %v144_v51 = vsel %vm143_vm1, %v139_v29, %v140_v43  ;;  %v1274_v43 = vld [vmem:[#allocation2 + $0x8] sm:$0xff] }
  0xae   :  { %v172_v52 = vmul.f32 %v1051_v46, %v161_v48  ;;  %v173_v53 = vmul.f32 %v1052_v47, %v164_v49  ;;  %v152_v4 = vmul.f32 %v148_v0, %v147_v50  ;;  %v154_v27 = vmul.f32 %v150_v21, %v145_v37  ;;  %v230_v37 = vld [vmem:[%s1879_s3] sm:$0xff]  ;;  %536 = vmatpush.bf16.msrb.mxu0 %v1274_v43  ;;  %v231_v45 = vld [vmem:[%s1879_s3 + $0x8] sm:$0xff] }
  0xaf   :  { %v155_v28 = vmul.f32 %v151_v22, %v144_v51  ;;  %v1271_v46 = vld [vmem:[%s1885_s9] sm:$0xff] }
  0xb0   :  { %v1312_v54 = vpack.i.bf16 %v173_v53, %v172_v52  ;;  %v1273_v47 = vld [vmem:[#allocation2] sm:$0xff]  ;;  %482 = vmatpush.bf16.msra.mxu3 %v1271_v46 }
  0xb2   :  { %537 = vmatpush.bf16.msrb.mxu0 %v1273_v47  ;;  %v310_v47 = vld [vmem:[%s1880_s4 + $0x10] sm:$0xff] }
  0xb5   :  { %1313 = vrot.lane.b32.xlu1 %v1312_v54, %s1419_s29  ;;  %v232_v54 = vld [vmem:[%s1879_s3 + $0x10] sm:$0xff] }
 0x10f   :  { %v1299_v63 = vpop.permute.xlu0 %1298 }
 0x110   :  { %v1301_v2 = vunpack.i.h.bf16 %v1299_v63  ;;  %v1300_v3 = vunpack.i.l.bf16 %v1299_v63  ;;  %v233_v63 = vld [vmem:[%s1879_s3 + $0x18] sm:$0xff] }
 0x112   :  { %v207_v14 = vsel %vm206_vm3, %v152_v4, %v1300_v3  ;;  %v208_v16 = vsel %vm206_vm3, %v153_v6, %v1301_v2  ;;  %v309_v3 = vld [vmem:[%s1880_s4 + $0x8] sm:$0xff] }
 0x11c   :  { %v1304_v9 = vpop.permute.xlu0 %1303 }
 0x11d   :  { %v1306_v11 = vunpack.i.h.bf16 %v1304_v9  ;;  %v1305_v12 = vunpack.i.l.bf16 %v1304_v9 }
 0x11f   :  { %v1309_v17 = vpop.permute.xlu1 %1308  ;;  %v212_v18 = vsel %vm211_vm4, %v207_v14, %v1305_v12  ;;  %v213_v19 = vsel %vm211_vm4, %v208_v16, %v1306_v11 }
 0x120   :  { %v216_v20 = vpack.c.bf16 %v213_v19, %v212_v18  ;;  %v1311_v24 = vunpack.i.h.bf16 %v1309_v17  ;;  %v1310_v25 = vunpack.i.l.bf16 %v1309_v17 }
 0x122   :  { %1077 = vmatmul.msk.bf16.vlgmr.msra.gmra.mxu1 %vm270_vm5, %v216_v20  ;;  %1103 = vmatmul.msk.bf16.vlgmr.msra.gmra.mxu2 %vm270_vm5, %v216_v20  ;;  %v209_v32 = vsel %vm206_vm3, %v154_v27, %v1310_v25  ;;  %v210_v33 = vsel %vm206_vm3, %v155_v28, %v1311_v24 }
 0x127   :  { %v1314_v29 = vpop.permute.xlu1 %1313 }
 0x128   :  { %v1316_v30 = vunpack.i.h.bf16 %v1314_v29  ;;  %v1315_v31 = vunpack.i.l.bf16 %v1314_v29 }
 0x12a   :  { %v214_v34 = vsel %vm211_vm4, %v209_v32, %v1315_v31  ;;  %v215_v36 = vsel %vm211_vm4, %v210_v33, %v1316_v30 }
 0x12b   :  { %v217_v38 = vpack.c.bf16 %v215_v36, %v214_v34 }
 0x132   :  { %1078 = vmatmul.msk.bf16.gmra.mxu1 %vm270_vm5, %v217_v38  ;;  %1104 = vmatmul.msk.bf16.gmra.mxu2 %vm270_vm5, %v217_v38 }
 0x19f   :  { %v286_v39 = vpop.f32.mrf.mxu1 }
 0x1a0   :  { %v287_v41 = vadd.f32 %v286_v39, %v230_v37 }
 0x1a2   :  { %v1105_v44 = vmul.f32 -1.442695, %v287_v41 }
 0x1a4   :  { %1344 = vpow2.f32 %v1105_v44 }
 0x1a5   :  { %v357_v51 = vpop.f32.mrf.mxu2 }
 0x1a6   :  { %v358_v11 = vadd.f32 %v357_v51, %v308_v1 }
 0x1a7   :  { %v288_v48 = vpop.f32.mrf.mxu1 }
 0x1a8   :  { %v289_v49 = vadd.f32 %v288_v48, %v231_v45  ;;  %v311_v48 = vld [vmem:[%s1880_s4 + $0x18] sm:$0xff] }
 0x1aa   :  { %v1345_v50 = vpop.eup %1344  ;;  %v1106_v52 = vmul.f32 -1.442695, %v289_v49 }
 0x1ab   :  { %v379_v53 = vadd.f32 1.0, %v1345_v50 }
 0x1ac   :  { %1346 = vpow2.f32 %v1106_v52 }
 0x1ad   :  { %1348 = vrcp.f32 %v379_v53  ;;  %v359_v62 = vpop.f32.mrf.mxu2  ;;  %v394_v20 = vand.u32 2147483648, %v379_v53  ;;  %vm388_vm7 = vweird.f32 %v379_v53  ;;  %v392_v24 = vand.u32 2147483647, %v379_v53 }
 0x1ae   :  { %v360_v16 = vadd.f32 %v359_v62, %v309_v3 }
 0x1af   :  { %v291_v55 = vpop.f32.mrf.mxu1  ;;  %v395_v30 = vor.u32 1.1754944e-38, %v394_v20  ;;  %vm393_vm10 = vcmp.eq.f32.partialorder %v392_v24, 8.507059e+37  ;;  %v1286_v24 = vld [vmem:[%s1884_s8 + $0x58] sm:$0xff] }
 0x1b0   :  { %v292_v56 = vadd.f32 %v291_v55, %v232_v54  ;;  %766 = vmatpush.bf16.msrb.mxu1 %v1286_v24 }
 0x1b2   :  { %v1347_v57 = vpop.eup %1346  ;;  %v1107_v58 = vmul.f32 -1.442695, %v292_v56 }
 0x1b3   :  { %v1349_v59 = vpop.eup %1348  ;;  %v380_v60 = vadd.f32 1.0, %v1347_v57 }
 0x1b4   :  { %v384_v61 = vmul.f32 %v1349_v59, %v379_v53  ;;  %1350 = vpow2.f32 %v1107_v58  ;;  %vm389_vm6 = vweird.f32 %v1349_v59 }
 0x1b5   :  { %1352 = vrcp.f32 %v380_v60  ;;  %v362_v22 = vpop.f32.mrf.mxu2  ;;  %vm390_vm8 = vmor %vm388_vm7, %vm389_vm6  ;;  %v409_v25 = vand.u32 2147483648, %v380_v60  ;;  %v407_v29 = vand.u32 2147483647, %v380_v60  ;;  %vm403_vm11 = vweird.f32 %v380_v60 }
 0x1b6   :  { %v385_v0 = vsub.f32 1.0, %v384_v61  ;;  %v363_v52 = vadd.f32 %v362_v22, %v310_v47  ;;  %v1280_v22 = vld [vmem:[%s1883_s7 + $0x58] sm:$0xff]  ;;  %v1134_v47 = vld [vmem:[%s1878_s2 + $0x68] sm:$0xff] }
 0x1b7   :  { %v293_v2 = vpop.f32.mrf.mxu1  ;;  %v410_v38 = vor.u32 1.1754944e-38, %v409_v25  ;;  %vm408_vm13 = vcmp.eq.f32.partialorder %v407_v29, 8.507059e+37  ;;  %693 = vmatpush.bf16.msrb.mxu3 %v1280_v22 }
 0x1b8   :  { %v294_v4 = vadd.f32 %v293_v2, %v233_v63  ;;  %v386_v6 = vmul.f32 %v1349_v59, %v385_v0 }
 0x1ba   :  { %v1351_v9 = vpop.eup %1350  ;;  %v1108_v12 = vmul.f32 -1.442695, %v294_v4  ;;  %v387_v19 = vadd.f32 %v1349_v59, %v386_v6 }
 0x1bb   :  { %v1353_v14 = vpop.eup %1352  ;;  %v1680_v17 = vadd.f32 1.0, %v1351_v9  ;;  %694 = vmatpush.bf16.msrb.mxu3 %v1279_v5 }
 0x1bc   :  { %v399_v18 = vmul.f32 %v1353_v14, %v380_v60  ;;  %1354 = vpow2.f32 %v1108_v12  ;;  %v391_v27 = vsel %vm390_vm8, %v1349_v59, %v387_v19  ;;  %vm404_vm9 = vweird.f32 %v1353_v14  ;;  %v1340_v19 = vld [vmem:[%s1886_s10] ss:$0 sm:$0xff] }
 0x1bd   :  { %1356 = vrcp.f32 %v1680_v17  ;;  %v396_v36 = vsel %vm393_vm10, %v395_v30, %v391_v27  ;;  %vm405_vm12 = vmor %vm403_vm11, %vm404_vm9  ;;  %v364_v49 = vpop.f32.mrf.mxu2  ;;  %v424_v57 = vand.u32 2147483648, %v1680_v17  ;;  %vm418_vm15 = vweird.f32 %v1680_v17 }
 0x1be   :  { %1358 = vtanh.f32 %v358_v11  ;;  %v400_v21 = vsub.f32 1.0, %v399_v18  ;;  %v365_v54 = vadd.f32 %v364_v49, %v311_v48  ;;  %v422_v59 = vand.u32 2147483647, %v1680_v17 }
 0x1bf   :  { %1360 = vtanh.f32 %v360_v16  ;;  %v425_v0 = vor.u32 1.1754944e-38, %v424_v57  ;;  %vm557_vm10 = vcmp.lt.s32.totalorder %v1547_v13, 2  ;;  %vm575_vm11 = vcmp.lt.s32.totalorder %v1547_v13, 6  ;;  %v1135_v57 = vld [vmem:[%s1878_s2 + $0x70] sm:$0xff]  ;;  %v1277_v13 = vld [vmem:[%s1883_s7 + $0x40] sm:$0xff] }
 0x1c0   :  { %v401_v28 = vmul.f32 %v1353_v14, %v400_v21  ;;  %vm423_vm6 = vcmp.eq.f32.partialorder %v422_v59, 8.507059e+37 }
 0x1c2   :  { %v1355_v31 = vpop.eup %1354  ;;  %v402_v32 = vadd.f32 %v1353_v14, %v401_v28 }
 0x1c3   :  { %v1357_v33 = vpop.eup %1356  ;;  %v382_v34 = vadd.f32 1.0, %v1355_v31 }
 0x1c4   :  { %v1359_v37 = vpop.eup %1358  ;;  %v414_v39 = vmul.f32 %v1357_v33, %v1680_v17  ;;  %v406_v41 = vsel %vm405_vm12, %v1353_v14, %v402_v32  ;;  %vm419_vm14 = vweird.f32 %v1357_v33 }
 0x1c5   :  { %v1361_v42 = vpop.eup %1360  ;;  %1362 = vrcp.f32 %v382_v34  ;;  %v411_v43 = vsel %vm408_vm13, %v410_v38, %v406_v41  ;;  %v447_v45 = vmul.f32 %v1359_v37, %v396_v36  ;;  %vm420_vm1 = vmor %vm418_vm15, %vm419_vm14  ;;  %v439_v60 = vand.u32 2147483648, %v382_v34 }
 0x1c6   :  { %v415_v44 = vsub.f32 1.0, %v414_v39  ;;  %v448_v46 = vmul.f32 %v1361_v42, %v411_v43  ;;  %1364 = vtanh.f32 %v363_v52  ;;  %v437_v63 = vand.u32 2147483647, %v382_v34 }
 0x1c7   :  { %1366 = vtanh.f32 %v365_v54  ;;  %vm433_vm7 = vweird.f32 %v382_v34  ;;  %v440_v3 = vor.u32 1.1754944e-38, %v439_v60 }
 0x1c8   :  { %v451_v50 = vpack.c.bf16 %v448_v46, %v447_v45  ;;  %v416_v51 = vmul.f32 %v1357_v33, %v415_v44  ;;  %vm438_vm9 = vcmp.eq.f32.partialorder %v437_v63, 8.507059e+37  ;;  %v1133_v46 = vld [vmem:[%s1878_s2 + $0x60] sm:$0xff] }
 0x1ca   :  { %1117 = vmatmul.msk.bf16.vlgmr.msra.gmra.mxu3 %vm206_vm3, %v451_v50  ;;  %1127 = vmatmul.msk.bf16.vlgmr.msrb.gmra.mxu0 %vm206_vm3, %v451_v50  ;;  %v417_v56 = vadd.f32 %v1357_v33, %v416_v51 }
 0x1cb   :  { %v1363_v53 = vpop.eup %1362 }
 0x1cc   :  { %v429_v55 = vmul.f32 %v1363_v53, %v382_v34  ;;  %v421_v61 = vsel %vm420_vm1, %v1357_v33, %v417_v56  ;;  %vm434_vm2 = vweird.f32 %v1363_v53  ;;  %v1365_v4 = vpop.eup %1364 }
 0x1cd   :  { %v426_v2 = vsel %vm423_vm6, %v425_v0, %v421_v61  ;;  %vm435_vm8 = vmor %vm433_vm7, %vm434_vm2  ;;  %v1367_v9 = vpop.eup %1366 }
 0x1ce   :  { %v430_v58 = vsub.f32 1.0, %v429_v55  ;;  %v449_v12 = vmul.f32 %v1365_v4, %v426_v2  ;;  %v1284_v2 = vld [vmem:[%s1884_s8 + $0x48] sm:$0xff]  ;;  %v1276_v4 = vld [vmem:[%s1883_s7 + $0x38] sm:$0xff] }
 0x1d0   :  { %v431_v62 = vmul.f32 %v1363_v53, %v430_v58  ;;  %v1136_v58 = vld [vmem:[%s1878_s2 + $0x78] sm:$0xff] }
 0x1d2   :  { %v432_v1 = vadd.f32 %v1363_v53, %v431_v62 }
 0x1d4   :  { %v436_v6 = vsel %vm435_vm8, %v1363_v53, %v432_v1  ;;  %v1278_v1 = vld [vmem:[%s1883_s7 + $0x48] sm:$0xff] }
 0x1d5   :  { %v441_v11 = vsel %vm438_vm9, %v440_v3, %v436_v6  ;;  %695 = vmatpush.bf16.msrb.mxu3 %v1278_v1  ;;  %v1283_v3 = vld [vmem:[%s1884_s8 + $0x40] sm:$0xff]  ;;  %v1282_v6 = vld [vmem:[%s1884_s8 + $0x38] sm:$0xff] }
 0x1d6   :  { %v450_v14 = vmul.f32 %v1367_v9, %v441_v11  ;;  %v1275_v9 = vld [vmem:[%s1883_s7 + $0x30] sm:$0xff] }
 0x1d7   :  { %v1281_v11 = vld [vmem:[%s1884_s8 + $0x30] sm:$0xff] }
 0x1d8   :  { %v452_v16 = vpack.c.bf16 %v450_v14, %v449_v12  ;;  %v1129_v14 = vld [vmem:[%s1878_s2 + $0x40] sm:$0xff] }
 0x1d9   :  { %696 = vmatpush.bf16.msrb.mxu3 %v1277_v13 }
 0x1da   :  { %1118 = vmatmul.msk.bf16.gmra.mxu3 %vm206_vm3, %v452_v16  ;;  %1128 = vmatmul.msk.bf16.gmra.mxu0 %vm206_vm3, %v452_v16  ;;  %v1130_v16 = vld [vmem:[%s1878_s2 + $0x48] sm:$0xff] }
 0x1dd   :  { %697 = vmatpush.bf16.msrb.mxu3 %v1276_v4 }
 0x1e1   :  { %698 = vmatpush.bf16.msrb.mxu3 %v1275_v9 }
 0x24d   :  { %v484_v17 = vpop.f32.mrf.mxu3 }
 0x24e   :  { %v494_v18 = vadd.f32 %v484_v17, %v125_v7  ;;  %v1285_v7 = vld [vmem:[%s1884_s8 + $0x50] sm:$0xff] }
 0x24f   :  { %767 = vmatpush.bf16.msrb.mxu1 %v1285_v7 }
 0x250   :  { %v502_v20 = vadd.f32 %v1340_v19, %v494_v18 }
 0x252   :  { %v506_v25 = vmul.f32 0.70710677, %v502_v20 }
 0x253   :  { %768 = vmatpush.bf16.msrb.mxu1 %v1284_v2  ;;  %v1151_v2 = vld [vmem:[%s1879_s3 + $0x30] sm:$0xff] }
 0x254   :  { %v549_v29 = vadd.f32 %v1537_v8, %v506_v25 }
 0x255   :  { %v486_v21 = vpop.f32.mrf.mxu3 }
 0x256   :  { %v495_v27 = vadd.f32 %v486_v21, %v126_v15  ;;  %v553_v15 = vrot.slane %v549_v29, 6  ;;  %v571_v42 = vrot.slane %v549_v29, 2 }
 0x257   :  { %769 = vmatpush.bf16.msrb.mxu1 %v1283_v3 }
 0x258   :  { %v503_v28 = vadd.f32 %v1340_v19, %v495_v27 }
 0x25a   :  { %v507_v30 = vmul.f32 0.70710677, %v503_v28 }
 0x25b   :  { %770 = vmatpush.bf16.msrb.mxu1 %v1282_v6 }
 0x25c   :  { %v550_v31 = vadd.f32 %v1537_v8, %v507_v30  ;;  %v1131_v30 = vld [vmem:[%s1878_s2 + $0x50] sm:$0xff] }
 0x25d   :  { %v489_v10 = vpop.f32.mrf.mxu3 }
 0x25e   :  { %v554_v32 = vrot.slane %v550_v31, 6  ;;  %v496_v33 = vadd.f32 %v489_v10, %v127_v26  ;;  %v1317_v34 = vpack.i.bf16 %v550_v31, %v549_v29  ;;  %v572_v39 = vrot.slane %v550_v31, 2  ;;  %v1132_v31 = vld [vmem:[%s1878_s2 + $0x58] sm:$0xff] }
 0x25f   :  { %771 = vmatpush.bf16.msrb.mxu1 %v1281_v11 }
 0x260   :  { %v504_v36 = vadd.f32 %v1340_v19, %v496_v33  ;;  %1318 = vrot.lane.b32.xlu2 %v1317_v34, %s1421_s1  ;;  %v560_v38 = vsel %vm557_vm10, %v553_v15, %v554_v32  ;;  %v578_v45 = vsel %vm575_vm11, %v571_v42, %v572_v39 }
 0x261   :  { %v568_v20 = vmul.f32 %v1130_v16, %v560_v38 }
 0x262   :  { %v508_v37 = vmul.f32 0.70710677, %v504_v36 }
 0x264   :  { %v551_v41 = vadd.f32 %v1537_v8, %v508_v37 }
 0x265   :  { %v491_v43 = vpop.f32.mrf.mxu3 }
 0x266   :  { %v555_v44 = vrot.slane %v551_v41, 6  ;;  %v497_v23 = vadd.f32 %v491_v43, %v128_v40  ;;  %v573_v26 = vrot.slane %v551_v41, 2  ;;  %v585_v40 = vmul.f32 %v1133_v46, %v578_v45  ;;  %v1288_v45 = vld [vmem:[#allocation2 + $0x18] sm:$0xff] }
 0x267   :  { %898 = vmatpush.bf16.msrb.mxu2 %v1288_v45 }
 0x268   :  { %v505_v48 = vadd.f32 %v1340_v19, %v497_v23  ;;  %v577_v49 = vsel %vm575_vm11, %v572_v39, %v573_v26  ;;  %v559_v35 = vsel %vm557_vm10, %v554_v32, %v555_v44 }
 0x269   :  { %v586_v50 = vmul.f32 %v1134_v47, %v577_v49  ;;  %v569_v32 = vmul.f32 %v1131_v30, %v559_v35  ;;  %v1150_v47 = vld [vmem:[%s1879_s3 + $0x28] sm:$0xff] }
 0x26a   :  { %v509_v51 = vmul.f32 0.70710677, %v505_v48  ;;  %v1287_v48 = vld [vmem:[#allocation2 + $0x10] sm:$0xff] }
 0x26b   :  { %v1322_v52 = vpack.i.bf16 %v586_v50, %v585_v40  ;;  %899 = vmatpush.bf16.msrb.mxu2 %v1287_v48 }
 0x26c   :  { %v552_v53 = vadd.f32 %v1537_v8, %v509_v51 }
 0x26d   :  { %1323 = vrot.lane.b32.xlu2 %v1322_v52, %s1419_s29 }
 0x26e   :  { %v556_v54 = vrot.slane %v552_v53, 6  ;;  %v1327_v55 = vpack.i.bf16 %v552_v53, %v551_v41  ;;  %v574_v56 = vrot.slane %v552_v53, 2 }
 0x270   :  { %1328 = vrot.lane.b32.xlu0 %v1327_v55, %s1421_s1  ;;  %v576_v59 = vsel %vm575_vm11, %v573_v26, %v574_v56  ;;  %v579_v8 = vsel %vm575_vm11, %v574_v56, %v571_v42  ;;  %v561_v60 = vsel %vm557_vm10, %v556_v54, %v553_v15  ;;  %v558_v61 = vsel %vm557_vm10, %v555_v44, %v556_v54  ;;  %v1149_v44 = vld [vmem:[%s1879_s3 + $0x20] sm:$0xff] }
 0x271   :  { %v587_v62 = vmul.f32 %v1135_v57, %v576_v59  ;;  %v588_v63 = vmul.f32 %v1136_v58, %v579_v8  ;;  %v567_v19 = vmul.f32 %v1129_v14, %v561_v60  ;;  %v570_v33 = vmul.f32 %v1132_v31, %v558_v61  ;;  %v1191_v58 = vld [vmem:[%s1880_s4 + $0x20] sm:$0xff]  ;;  %v1192_v8 = vld [vmem:[%s1880_s4 + $0x28] sm:$0xff] }
 0x273   :  { %v1332_v0 = vpack.i.bf16 %v588_v63, %v587_v62 }
 0x275   :  { %1333 = vrot.lane.b32.xlu1 %v1332_v0, %s1419_s29 }
 0x2ba   :  { %v1319_v12 = vpop.permute.xlu2 %1318 }
 0x2bb   :  { %v1321_v17 = vunpack.i.h.bf16 %v1319_v12  ;;  %v1320_v18 = vunpack.i.l.bf16 %v1319_v12 }
 0x2bd   :  { %v621_v25 = vsel %vm206_vm3, %v567_v19, %v1320_v18  ;;  %v622_v27 = vsel %vm206_vm3, %v568_v20, %v1321_v17 }
 0x2c7   :  { %v1324_v21 = vpop.permute.xlu2 %1323 }
 0x2c8   :  { %v1326_v22 = vunpack.i.h.bf16 %v1324_v21  ;;  %v1325_v24 = vunpack.i.l.bf16 %v1324_v21 }
 0x2ca   :  { %v626_v5 = vsel %vm211_vm4, %v622_v27, %v1326_v22  ;;  %v625_v7 = vsel %vm211_vm4, %v621_v25, %v1325_v24  ;;  %v1152_v27 = vld [vmem:[%s1879_s3 + $0x38] sm:$0xff] }
 0x2cb   :  { %v629_v28 = vpack.c.bf16 %v626_v5, %v625_v7 }
 0x2cd   :  { %1177 = vmatmul.msk.bf16.vlgmr.msrb.gmra.mxu3 %vm270_vm5, %v629_v28  ;;  %1219 = vmatmul.msk.bf16.vlgmr.msrb.gmra.mxu1 %vm270_vm5, %v629_v28 }
 0x2e2   :  { %v1329_v29 = vpop.permute.xlu0 %1328 }
 0x2e3   :  { %v1331_v10 = vunpack.i.h.bf16 %v1329_v29  ;;  %v1330_v15 = vunpack.i.l.bf16 %v1329_v29 }
 0x2e5   :  { %v623_v37 = vsel %vm206_vm3, %v569_v32, %v1330_v15  ;;  %v624_v39 = vsel %vm206_vm3, %v570_v33, %v1331_v10 }
 0x2e7   :  { %v1334_v34 = vpop.permute.xlu1 %1333 }
 0x2e8   :  { %v1336_v36 = vunpack.i.h.bf16 %v1334_v34  ;;  %v1335_v38 = vunpack.i.l.bf16 %v1334_v34 }
 0x2ea   :  { %v627_v41 = vsel %vm211_vm4, %v623_v37, %v1335_v38  ;;  %v628_v42 = vsel %vm211_vm4, %v624_v39, %v1336_v36 }
 0x2eb   :  { %v630_v43 = vpack.c.bf16 %v628_v42, %v627_v41  ;;  %v1193_v41 = vld [vmem:[%s1880_s4 + $0x30] sm:$0xff]  ;;  %v1194_v42 = vld [vmem:[%s1880_s4 + $0x38] sm:$0xff] }
 0x2ed   :  { %1178 = vmatmul.msk.bf16.gmra.mxu3 %vm270_vm5, %v630_v43  ;;  %1220 = vmatmul.msk.bf16.gmra.mxu1 %vm270_vm5, %v630_v43 }
 0x34a   :  { %v773_v52 = vpop.f32.mrf.mxu1 }
 0x34b   :  { %v774_v61 = vadd.f32 %v1191_v58, %v773_v52 }
 0x350   :  { %v700_v23 = vpop.f32.mrf.mxu3 }
 0x351   :  { %v701_v26 = vadd.f32 %v1149_v44, %v700_v23 }
 0x352   :  { %v775_v60 = vpop.f32.mrf.mxu1 }
 0x353   :  { %v1221_v46 = vmul.f32 -1.442695, %v701_v26  ;;  %v776_v63 = vadd.f32 %v1192_v8, %v775_v60 }
 0x355   :  { %1368 = vpow2.f32 %v1221_v46 }
 0x358   :  { %v702_v49 = vpop.f32.mrf.mxu3 }
 0x359   :  { %v703_v35 = vadd.f32 %v1150_v47, %v702_v49 }
 0x35b   :  { %v1369_v40 = vpop.eup %1368  ;;  %v1222_v50 = vmul.f32 -1.442695, %v703_v35 }
 0x35c   :  { %v795_v51 = vadd.f32 1.0, %v1369_v40 }
 0x35d   :  { %1370 = vpow2.f32 %v1222_v50 }
 0x35e   :  { %1372 = vrcp.f32 %v795_v51  ;;  %v810_v13 = vand.u32 2147483648, %v795_v51  ;;  %vm804_vm5 = vweird.f32 %v795_v51  ;;  %v808_v4 = vand.u32 2147483647, %v795_v51 }
 0x360   :  { %v811_v17 = vor.u32 1.1754944e-38, %v810_v13  ;;  %vm809_vm15 = vcmp.eq.f32.partialorder %v808_v4, 8.507059e+37 }
 0x363   :  { %v1371_v53 = vpop.eup %1370 }
 0x364   :  { %v1373_v54 = vpop.eup %1372  ;;  %v796_v55 = vadd.f32 1.0, %v1371_v53 }
 0x365   :  { %v800_v56 = vmul.f32 %v1373_v54, %v795_v51  ;;  %vm805_vm4 = vweird.f32 %v1373_v54 }
 0x366   :  { %1374 = vrcp.f32 %v796_v55  ;;  %vm806_vm12 = vmor %vm804_vm5, %vm805_vm4  ;;  %v823_v9 = vand.u32 2147483647, %v796_v55  ;;  %v825_v11 = vand.u32 2147483648, %v796_v55  ;;  %vm819_vm14 = vweird.f32 %v796_v55 }
 0x367   :  { %v801_v57 = vsub.f32 1.0, %v800_v56  ;;  %1376 = vtanh.f32 %v774_v61 }
 0x368   :  { %1378 = vtanh.f32 %v776_v63  ;;  %v826_v21 = vor.u32 1.1754944e-38, %v825_v11  ;;  %vm824_vm2 = vcmp.eq.f32.partialorder %v823_v9, 8.507059e+37  ;;  %v1290_v63 = vld [vmem:[%s1889_s13 + $0x8] sm:$0xff]  ;;  %v1341_v9 = vld [vmem:[%s1888_s12 + $0x1] ss:$0 sm:$0xff] }
 0x369   :  { %v802_v59 = vmul.f32 %v1373_v54, %v801_v57  ;;  %962 = vmatpush.bf16.msra.mxu0 %v1290_v63 }
 0x36a   :  { %v778_v33 = vpop.f32.mrf.mxu1 }
 0x36b   :  { %v803_v1 = vadd.f32 %v1373_v54, %v802_v59  ;;  %v779_v23 = vadd.f32 %v1193_v41, %v778_v33  ;;  %v1291_v33 = vld [vmem:[%s1891_s15] sm:$0xff] }
 0x36c   :  { %v1375_v62 = vpop.eup %1374 }
 0x36d   :  { %v815_v0 = vmul.f32 %v1375_v62, %v796_v55  ;;  %v807_v16 = vsel %vm806_vm12, %v1373_v54, %v803_v1  ;;  %vm820_vm13 = vweird.f32 %v1375_v62  ;;  %v1377_v22 = vpop.eup %1376  ;;  %v539_v1 = vpop.f32.mrf.mxu0 }
 0x36e   :  { %v812_v20 = vsel %vm809_vm15, %v811_v17, %v807_v16  ;;  %vm821_vm1 = vmor %vm819_vm14, %vm820_vm13  ;;  %v1379_v25 = vpop.eup %1378 }
 0x36f   :  { %v816_v3 = vsub.f32 1.0, %v815_v0  ;;  %v863_v7 = vmul.f32 %v1377_v22, %v812_v20  ;;  %v1289_v0 = vld [vmem:[%s1889_s13] sm:$0xff] }
 0x370   :  { %v705_v6 = vpop.f32.mrf.mxu3  ;;  %963 = vmatpush.bf16.msra.mxu0 %v1289_v0 }
 0x371   :  { %v817_v12 = vmul.f32 %v1375_v62, %v816_v3  ;;  %v706_v14 = vadd.f32 %v1151_v2, %v705_v6  ;;  %v1339_v2 = vld [vmem:[%s1888_s12] ss:$0 sm:$0xff] }
 0x372   :  { %v780_v43 = vpop.f32.mrf.mxu1  ;;  %v540_v3 = vadd.f32 %v1339_v2, %v539_v1 }
 0x373   :  { %v1223_v18 = vmul.f32 -1.442695, %v706_v14  ;;  %v818_v19 = vadd.f32 %v1375_v62, %v817_v12  ;;  %v781_v45 = vadd.f32 %v1194_v42, %v780_v43 }
 0x375   :  { %1380 = vpow2.f32 %v1223_v18  ;;  %v822_v24 = vsel %vm821_vm1, %v1375_v62, %v818_v19  ;;  %v541_v4 = vpop.f32.mrf.mxu0 }
 0x376   :  { %v827_v5 = vsel %vm824_vm2, %v826_v21, %v822_v24  ;;  %v542_v11 = vadd.f32 %v1339_v2, %v541_v4  ;;  %v1292_v21 = vld [vmem:[%s1891_s15 + $0x8] sm:$0xff] }
 0x377   :  { %v864_v28 = vmul.f32 %v1379_v25, %v827_v5  ;;  %1013 = vmatpush.bf16.msra.mxu3 %v1292_v21 }
 0x378   :  { %v707_v29 = vpop.f32.mrf.mxu3 }
 0x379   :  { %v708_v30 = vadd.f32 %v1152_v27, %v707_v29  ;;  %v867_v31 = vpack.c.bf16 %v864_v28, %v863_v7 }
 0x37b   :  { %v1381_v10 = vpop.eup %1380  ;;  %v1224_v15 = vmul.f32 -1.442695, %v708_v30  ;;  %1233 = vmatmul.msk.bf16.vlgmr.msrb.gmra.mxu2 %vm206_vm3, %v867_v31  ;;  %1014 = vmatpush.bf16.msra.mxu3 %v1291_v33 }
 0x37c   :  { %v797_v32 = vadd.f32 1.0, %v1381_v10 }
 0x37d   :  { %1382 = vpow2.f32 %v1224_v15  ;;  %v544_v22 = vpop.f32.mrf.mxu0 }
 0x37e   :  { %1384 = vrcp.f32 %v797_v32  ;;  %v840_v48 = vand.u32 2147483648, %v797_v32  ;;  %vm834_vm7 = vweird.f32 %v797_v32  ;;  %v838_v35 = vand.u32 2147483647, %v797_v32 }
 0x37f   :  { %v545_v25 = vadd.f32 %v1339_v2, %v544_v22 }
 0x380   :  { %v841_v53 = vor.u32 1.1754944e-38, %v840_v48  ;;  %vm839_vm10 = vcmp.eq.f32.partialorder %v838_v35, 8.507059e+37 }
 0x383   :  { %v1383_v34 = vpop.eup %1382 }
 0x384   :  { %v1385_v36 = vpop.eup %1384  ;;  %v798_v38 = vadd.f32 1.0, %v1383_v34 }
 0x385   :  { %v830_v37 = vmul.f32 %v1385_v36, %v797_v32  ;;  %vm835_vm6 = vweird.f32 %v1385_v36  ;;  %v546_v27 = vpop.f32.mrf.mxu0 }
 0x386   :  { %1386 = vrcp.f32 %v798_v38  ;;  %vm836_vm8 = vmor %vm834_vm7, %vm835_vm6  ;;  %v855_v40 = vand.u32 2147483648, %v798_v38  ;;  %v853_v52 = vand.u32 2147483647, %v798_v38  ;;  %vm849_vm11 = vweird.f32 %v798_v38 }
 0x387   :  { %v831_v39 = vsub.f32 1.0, %v830_v37  ;;  %1388 = vtanh.f32 %v779_v23  ;;  %v547_v7 = vadd.f32 %v1339_v2, %v546_v27 }
 0x388   :  { %1390 = vtanh.f32 %v781_v45  ;;  %v856_v56 = vor.u32 1.1754944e-38, %v855_v40  ;;  %vm854_vm5 = vcmp.eq.f32.partialorder %v853_v52, 8.507059e+37 }
 0x389   :  { %v832_v44 = vmul.f32 %v1385_v36, %v831_v39 }
 0x38b   :  { %v833_v47 = vadd.f32 %v1385_v36, %v832_v44 }
 0x38c   :  { %v1387_v26 = vpop.eup %1386 }
 0x38d   :  { %v845_v46 = vmul.f32 %v1387_v26, %v798_v38  ;;  %v837_v50 = vsel %vm836_vm8, %v1385_v36, %v833_v47  ;;  %vm850_vm9 = vweird.f32 %v1387_v26  ;;  %v1389_v57 = vpop.eup %1388  ;;  %v1342_v36 = vld [vmem:[%s1890_s14] ss:$0 sm:$0xff] }
 0x38e   :  { %v842_v55 = vsel %vm839_vm10, %v841_v53, %v837_v50  ;;  %vm851_vm4 = vmor %vm849_vm11, %vm850_vm9  ;;  %v1391_v59 = vpop.eup %1390 }
 0x38f   :  { %v846_v49 = vsub.f32 1.0, %v845_v46  ;;  %v865_v60 = vmul.f32 %v1389_v57, %v842_v55 }
 0x391   :  { %v847_v51 = vmul.f32 %v1387_v26, %v846_v49  ;;  %v1343_v49 = vld [vmem:[%s1892_s16] ss:$0 sm:$0xff] }
 0x393   :  { %v848_v54 = vadd.f32 %v1387_v26, %v847_v51 }
 0x395   :  { %v852_v58 = vsel %vm851_vm4, %v1387_v26, %v848_v54 }
 0x396   :  { %v857_v8 = vsel %vm854_vm5, %v856_v56, %v852_v58 }
 0x397   :  { %v866_v61 = vmul.f32 %v1391_v59, %v857_v8 }
 0x399   :  { %v868_v62 = vpack.c.bf16 %v866_v61, %v865_v60 }
 0x39b   :  { %1234 = vmatmul.msk.bf16.gmra.mxu2 %vm206_vm3, %v868_v62 }
 0x3fe   :  { %v901_v13 = vpop.f32.mrf.mxu2 }
 0x3ff   :  { %v911_v6 = vadd.f32 %v901_v13, %v540_v3 }
 0x401   :  { %v920_v14 = vadd.f32 %v1341_v9, %v911_v6 }
 0x403   :  { %v924_v18 = vmul.f32 0.70710677, %v920_v14 }
 0x406   :  { %v903_v12 = vpop.f32.mrf.mxu2 }
 0x407   :  { %v912_v16 = vadd.f32 %v903_v12, %v542_v11 }
 0x409   :  { %v921_v17 = vadd.f32 %v1341_v9, %v912_v16 }
 0x40b   :  { %v925_v19 = vmul.f32 0.70710677, %v921_v17 }
 0x40d   :  { %v928_v20 = vpack.c.bf16 %v925_v19, %v924_v18 }
 0x40f   :  { %1244 = vmatmul.msk.bf16.vlgmr.msra.gmra.mxu0 %vm206_vm3, %v928_v20 }
 0x41e   :  { %v906_v24 = vpop.f32.mrf.mxu2 }
 0x41f   :  { %v913_v5 = vadd.f32 %v906_v24, %v545_v25 }
 0x421   :  { %v922_v29 = vadd.f32 %v1341_v9, %v913_v5 }
 0x423   :  { %v926_v10 = vmul.f32 0.70710677, %v922_v29 }
 0x426   :  { %v908_v28 = vpop.f32.mrf.mxu2 }
 0x427   :  { %v914_v30 = vadd.f32 %v908_v28, %v547_v7 }
 0x429   :  { %v923_v31 = vadd.f32 %v1341_v9, %v914_v30 }
 0x42b   :  { %v927_v15 = vmul.f32 0.70710677, %v923_v31 }
 0x42d   :  { %v929_v32 = vpack.c.bf16 %v927_v15, %v926_v10 }
 0x42f   :  { %1245 = vmatmul.msk.bf16.gmra.mxu0 %vm206_vm3, %v929_v32 }
 0x48c   :  { %v965_v34 = vpop.f32.mrf.mxu0 }
 0x48d   :  { %v966_v38 = vadd.f32 %v1342_v36, %v965_v34 }
 0x48f   :  { %v975_v41 = vmax.f32 %v966_v38, 0.0 }
 0x494   :  { %v967_v37 = vpop.f32.mrf.mxu0 }
 0x495   :  { %v968_v39 = vadd.f32 %v1342_v36, %v967_v37 }
 0x497   :  { %v976_v42 = vmax.f32 %v968_v39, 0.0 }
 0x499   :  { %v979_v43 = vpack.c.bf16 %v976_v42, %v975_v41 }
 0x49b   :  { %1254 = vmatmul.msk.bf16.vlgmr.msra.gmra.mxu3 %vm206_vm3, %v979_v43 }
 0x4ac   :  { %v970_v44 = vpop.f32.mrf.mxu0 }
 0x4ad   :  { %v971_v23 = vadd.f32 %v1342_v36, %v970_v44 }
 0x4af   :  { %v977_v46 = vmax.f32 %v971_v23, 0.0 }
 0x4b4   :  { %v972_v26 = vpop.f32.mrf.mxu0 }
 0x4b5   :  { %v973_v45 = vadd.f32 %v1342_v36, %v972_v26 }
 0x4b7   :  { %v978_v47 = vmax.f32 %v973_v45, 0.0 }
 0x4b9   :  { %v980_v48 = vpack.c.bf16 %v978_v47, %v977_v46 }
 0x4bb   :  { %1255 = vmatmul.msk.bf16.gmra.mxu3 %vm206_vm3, %v980_v48 }
 0x51e   :  { %v1016_v35 = vpop.f32.mrf.mxu3 }
 0x51f   :  { %v1017_v40 = vadd.f32 %v1343_v49, %v1016_v35 }
 0x521   :  { %1026 = vst.msk [vmem:[%s1893_s17] sm:$0xff] %vm99_vm0, %v1017_v40 }
 0x526   :  { %v1018_v50 = vpop.f32.mrf.mxu3 }
 0x527   :  { %v1019_v51 = vadd.f32 %v1343_v49, %v1018_v50 }
 0x529   :  { %1027 = vst.msk [vmem:[%s1893_s17 + $0x8] sm:$0xff] %vm99_vm0, %v1019_v51 }
 0x53e   :  { %v1021_v52 = vpop.f32.mrf.mxu3 }
 0x53f   :  { %v1022_v53 = vadd.f32 %v1343_v49, %v1021_v52 }
 0x541   :  { %1028 = vst.msk [vmem:[%s1893_s17 + $0x10] sm:$0xff] %vm99_vm0, %v1022_v53 }
 0x546   :  { %v1023_v54 = vpop.f32.mrf.mxu3 }
 0x547   :  { %v1024_v55 = vadd.f32 %v1343_v49, %v1023_v54 }
 0x549   :  { %1029 = vst.msk [vmem:[%s1893_s17 + $0x18] sm:$0xff] %vm99_vm0, %v1024_v55 }
 0x54a   :  { %1034 = vsyncpa [#allocation3], 1 }

</bundles_post_ra>
